<compile_context>
chip_gen: v7x
topology: tpu7x:2x2x1
jax: 0.10.0
libtpu: 0.0.40
codegen_flags: <defaults>
</compile_context>

<pallas_src>
import jax
import jax.numpy as jnp
from jax import lax
from jax.experimental import pallas as pl
from jax.experimental.pallas import tpu as pltpu

K = 3          # kernel_size
PAD = 1        # padding
EPS = 1e-5     # BatchNorm1d default eps


def _pick_l_tile(l):
    """Largest lane-dense tile (multiple of 128) that divides L, else full L."""
    for t in (512, 256, 128):
        if l % t == 0:
            return t
    return l


def _conv_stats_kernel(xh_ref, w_ref, b_ref, yc_ref, st_ref):
    """Conv1d(+bias) on one (sample, L-tile) block + per-tile BN partial sums."""
    x2 = xh_ref[0, 0]                              # (C_in, L_tile + 2) halo'ed
    lt = x2.shape[1] - 2 * PAD
    # im2col: fold the K taps into the contraction dim (k-major rows).
    xcol = jnp.concatenate(
        [x2[:, 0:lt], x2[:, 1:lt + 1], x2[:, 2:lt + 2]], axis=0)  # (K*C_in, lt)
    y = jnp.dot(w_ref[...], xcol, preferred_element_type=jnp.float32)
    y = y + b_ref[...]                             # (C_out, lt) + (C_out, 1)
    yc_ref[0] = y.astype(yc_ref.dtype)
    # BN partials for this tile (sum over L within the tile).
    s = jnp.sum(y, axis=1, keepdims=True)          # (C_out, 1)
    sq = jnp.sum(y * y, axis=1, keepdims=True)     # (C_out, 1)
    st_ref[0, 0] = jnp.concatenate([s, sq], axis=1)  # (C_out, 2)


def _bn_prelu_kernel(yc_ref, sc_ref, sh_ref, a_ref, o_ref):
    """Apply folded BN (y*scale + shift) and PReLU on one tile."""
    y = yc_ref[0] * sc_ref[...] + sh_ref[...]      # (C_out, L_tile)
    alpha = a_ref[0]                               # SMEM scalar
    o_ref[0] = jnp.where(y > 0, y, alpha * y).astype(o_ref.dtype)


def conv_block(x, w, b, gamma, beta, alpha):
    """x: (N, C_in, L) f32 -> (N, C_out, L) f32  (Conv1d -> BN(train) -> PReLU)."""
    n, c_in, l = x.shape
    c_out = w.shape[0]
    l_tile = _pick_l_tile(l)
    n_lt = l // l_tile

    # Halo'ed input tiles: (N, n_lt, C_in, L_tile + 2). One fused HBM copy
    # (pad fused into the overlapping-window gather).
    xp = jnp.pad(x, ((0, 0), (0, 0), (PAD, PAD)))
    xh = jnp.stack(
        [xp[:, :, j * l_tile: j * l_tile + l_tile + 2 * PAD] for j in range(n_lt)],
        axis=1)

    # Weights folded for the single-dot formulation: (C_out, K*C_in), k-major.
    w2 = jnp.transpose(w, (0, 2, 1)).reshape(c_out, K * c_in)
    b2 = b.reshape(c_out, 1)

    cparams = pltpu.CompilerParams(
        dimension_semantics=("parallel", "parallel"),
        vmem_limit_bytes=32 * 1024 * 1024)

    # ---- Pass 1: conv + bias per tile, plus per-tile BN partial sums ----
    yc, stats = pl.pallas_call(
        _conv_stats_kernel,
        out_shape=(jax.ShapeDtypeStruct((n, c_out, l), jnp.float32),
                   jax.ShapeDtypeStruct((n, n_lt, c_out, 2), jnp.float32)),
        grid=(n, n_lt),
        in_specs=[
            pl.BlockSpec((1, 1, c_in, l_tile + 2 * PAD),
                         lambda i, j: (i, j, 0, 0)),
            pl.BlockSpec((c_out, K * c_in), lambda i, j: (0, 0)),
            pl.BlockSpec((c_out, 1), lambda i, j: (0, 0)),
        ],
        out_specs=(
            pl.BlockSpec((1, c_out, l_tile), lambda i, j: (i, 0, j)),
            pl.BlockSpec((1, 1, c_out, 2), lambda i, j: (i, j, 0, 0)),
        ),
        compiler_params=cparams,
    )(xh, w2, b2)

    # ---- Tiny global BN reduction + folding into scale/shift (plain JAX) ----
    cnt = jnp.float32(n * l)
    ssum = jnp.sum(stats[..., 0], axis=(0, 1))             # (C_out,)
    ssq = jnp.sum(stats[..., 1], axis=(0, 1))              # (C_out,)
    mean = ssum / cnt
    var = jnp.maximum(ssq / cnt - mean * mean, 0.0)         # biased batch var
    inv = lax.rsqrt(var + EPS)
    scale = (gamma * inv).reshape(c_out, 1)
    shift = (beta - mean * gamma * inv).reshape(c_out, 1)
    alpha1 = alpha.reshape(1).astype(jnp.float32)

    # ---- Pass 2: normalize + PReLU, tile by tile ----
    out = pl.pallas_call(
        _bn_prelu_kernel,
        out_shape=jax.ShapeDtypeStruct((n, c_out, l), x.dtype),
        grid=(n, n_lt),
        in_specs=[
            pl.BlockSpec((1, c_out, l_tile), lambda i, j: (i, 0, j)),
            pl.BlockSpec((c_out, 1), lambda i, j: (0, 0)),
            pl.BlockSpec((c_out, 1), lambda i, j: (0, 0)),
            pl.BlockSpec(memory_space=pltpu.MemorySpace.SMEM),
        ],
        out_specs=pl.BlockSpec((1, c_out, l_tile), lambda i, j: (i, 0, j)),
        compiler_params=cparams,
    )(yc, scale, shift, alpha1)
    return out


def reference(x, w, b, gamma, beta, alpha):
    """Pure-JAX reference mirroring the PyTorch training-mode forward."""
    y = lax.conv_general_dilated(
        x, w, window_strides=(1,), padding=[(PAD, PAD)],
        dimension_numbers=('NCH', 'OIH', 'NCH'))
    y = y + b[None, :, None]
    mean = jnp.mean(y, axis=(0, 2), keepdims=True)
    var = jnp.mean((y - mean) ** 2, axis=(0, 2), keepdims=True)
    y = (y - mean) / jnp.sqrt(var + EPS) * gamma[None, :, None] + beta[None, :, None]
    return jnp.where(y > 0, y, alpha[0] * y)


if __name__ == "__main__":
    N, C_IN, C_OUT, L = 2, 4, 8, 16

    key = jax.random.PRNGKey(0)
    kx, kw, kb = jax.random.split(key, 3)

    x = jax.random.normal(kx, (N, C_IN, L), jnp.float32)

    # Deterministic parameter init (shapes per nn.Conv1d / BatchNorm1d / PReLU).
    bound = 1.0 / (C_IN * K) ** 0.5
    w = jax.random.uniform(kw, (C_OUT, C_IN, K), jnp.float32, -bound, bound)
    b = jax.random.uniform(kb, (C_OUT,), jnp.float32, -bound, bound)
    gamma = jnp.ones((C_OUT,), jnp.float32)    # BN weight
    beta = jnp.zeros((C_OUT,), jnp.float32)    # BN bias
    alpha = jnp.full((1,), 0.25, jnp.float32)  # PReLU default

    fn = jax.jit(conv_block)
    out = jax.block_until_ready(fn(x, w, b, gamma, beta, alpha))
    ref = reference(x, w, b, gamma, beta, alpha)

    assert out.shape == (N, C_OUT, L)
    assert jnp.allclose(out, ref, atol=1e-4, rtol=1e-3), "mismatch vs reference"
    print("KERNEL_OK")
</pallas_src>

<mosaic_0001>
module attributes {stable_mosaic.version = 11 : i64} {
  func.func @_bn_prelu_kernel(%arg0: i32, %arg1: i32, %arg2: memref<1x8x16xf32, #tpu.memory_space<vmem>>, %arg3: memref<8x1xf32, #tpu.memory_space<vmem>>, %arg4: memref<8x1xf32, #tpu.memory_space<vmem>>, %arg5: memref<1xf32, #tpu.memory_space<smem>>, %arg6: memref<1x8x16xf32, #tpu.memory_space<vmem>>) attributes {dimension_semantics = [#tpu.dimension_semantics<parallel>, #tpu.dimension_semantics<parallel>], iteration_bounds = array<i64: 2, 1>, scalar_prefetch = 0 : i64, scratch_operands = 0 : i64, tpu.core_type = #tpu.core_type<tc>, window_params = [{transform_indices = @transform_0, window_bounds = array<i64: 1, 8, 16>}, {pipeline_mode = #tpu.pipeline_mode<synchronous>, transform_indices = @transform_1, window_bounds = array<i64: 8, 1>}, {pipeline_mode = #tpu.pipeline_mode<synchronous>, transform_indices = @transform_2, window_bounds = array<i64: 8, 1>}, {transform_indices = @transform_3, window_bounds = array<i64: 1>}, {transform_indices = @transform_4, window_bounds = array<i64: 1, 8, 16>}]} {
    %c0 = arith.constant 0 : index
    %c0_0 = arith.constant 0 : index
    %c0_1 = arith.constant 0 : index
    %0 = vector.load %arg2[%c0, %c0_0, %c0_1] : memref<1x8x16xf32, #tpu.memory_space<vmem>>, vector<1x8x16xf32>
    %1 = vector.shape_cast %0 : vector<1x8x16xf32> to vector<8x16xf32>
    %c0_2 = arith.constant 0 : index
    %c0_3 = arith.constant 0 : index
    %2 = vector.load %arg3[%c0_2, %c0_3] : memref<8x1xf32, #tpu.memory_space<vmem>>, vector<8x1xf32>
    %3 = vector.broadcast %2 : vector<8x1xf32> to vector<8x16xf32>
    %4 = arith.mulf %1, %3 : vector<8x16xf32>
    %c0_4 = arith.constant 0 : index
    %c0_5 = arith.constant 0 : index
    %5 = vector.load %arg4[%c0_4, %c0_5] : memref<8x1xf32, #tpu.memory_space<vmem>>, vector<8x1xf32>
    %6 = vector.broadcast %5 : vector<8x1xf32> to vector<8x16xf32>
    %7 = arith.addf %4, %6 : vector<8x16xf32>
    %c0_6 = arith.constant 0 : index
    %8 = memref.load %arg5[%c0_6] : memref<1xf32, #tpu.memory_space<smem>>
    %cst = arith.constant 0.000000e+00 : f32
    %9 = vector.broadcast %cst : f32 to vector<8x16xf32>
    %10 = arith.cmpf ogt, %7, %9 : vector<8x16xf32>
    %11 = vector.broadcast %8 : f32 to vector<8x16xf32>
    %12 = arith.mulf %11, %7 : vector<8x16xf32>
    %13 = arith.select %10, %7, %12 : vector<8x16xi1>, vector<8x16xf32>
    %c0_7 = arith.constant 0 : index
    %c0_8 = arith.constant 0 : index
    %c0_9 = arith.constant 0 : index
    %14 = vector.load %arg6[%c0_7, %c0_8, %c0_9] : memref<1x8x16xf32, #tpu.memory_space<vmem>>, vector<1x8x16xf32>
    %15 = vector.shape_cast %14 : vector<1x8x16xf32> to vector<8x16xf32>
    %16 = vector.shape_cast %13 : vector<8x16xf32> to vector<1x8x16xf32>
    tpu.vector_store %arg6[%c0_7, %c0_8, %c0_9], %16 {strides = array<i32>} : memref<1x8x16xf32, #tpu.memory_space<vmem>>, vector<1x8x16xf32>,
    return
  }
  func.func @transform_0(%arg0: i32, %arg1: i32) -> (i32, i32, i32) {
    %c0_i32 = arith.constant 0 : i32
    %c0_i32_0 = arith.constant 0 : i32
    return %arg0, %c0_i32, %arg1 : i32, i32, i32
  }
  func.func @transform_1(%arg0: i32, %arg1: i32) -> (i32, i32) {
    %c0_i32 = arith.constant 0 : i32
    %c0_i32_0 = arith.constant 0 : i32
    %c0_i32_1 = arith.constant 0 : i32
    return %c0_i32, %c0_i32_0 : i32, i32
  }
  func.func @transform_2(%arg0: i32, %arg1: i32) -> (i32, i32) {
    %c0_i32 = arith.constant 0 : i32
    %c0_i32_0 = arith.constant 0 : i32
    %c0_i32_1 = arith.constant 0 : i32
    return %c0_i32, %c0_i32_0 : i32, i32
  }
  func.func @transform_3(%arg0: i32, %arg1: i32) -> i32 {
    %c0_i32 = arith.constant 0 : i32
    %c0_i32_0 = arith.constant 0 : i32
    return %c0_i32 : i32
  }
  func.func @transform_4(%arg0: i32, %arg1: i32) -> (i32, i32, i32) {
    %c0_i32 = arith.constant 0 : i32
    %c0_i32_0 = arith.constant 0 : i32
    return %arg0, %c0_i32, %arg1 : i32, i32, i32
  }
}

module attributes {stable_mosaic.version = 11 : i64} {
  func.func @_conv_stats_kernel(%arg0: i32, %arg1: i32, %arg2: memref<1x1x4x18xf32, #tpu.memory_space<vmem>>, %arg3: memref<8x12xf32, #tpu.memory_space<vmem>>, %arg4: memref<8x1xf32, #tpu.memory_space<vmem>>, %arg5: memref<1x8x16xf32, #tpu.memory_space<vmem>>, %arg6: memref<1x1x8x2xf32, #tpu.memory_space<vmem>>) attributes {dimension_semantics = [#tpu.dimension_semantics<parallel>, #tpu.dimension_semantics<parallel>], iteration_bounds = array<i64: 2, 1>, scalar_prefetch = 0 : i64, scratch_operands = 0 : i64, tpu.core_type = #tpu.core_type<tc>, window_params = [{transform_indices = @transform_0, window_bounds = array<i64: 1, 1, 4, 18>}, {pipeline_mode = #tpu.pipeline_mode<synchronous>, transform_indices = @transform_1, window_bounds = array<i64: 8, 12>}, {pipeline_mode = #tpu.pipeline_mode<synchronous>, transform_indices = @transform_2, window_bounds = array<i64: 8, 1>}, {transform_indices = @transform_3, window_bounds = array<i64: 1, 8, 16>}, {transform_indices = @transform_4, window_bounds = array<i64: 1, 1, 8, 2>}]} {
    %c0 = arith.constant 0 : index
    %c0_0 = arith.constant 0 : index
    %c0_1 = arith.constant 0 : index
    %c0_2 = arith.constant 0 : index
    %0 = vector.load %arg2[%c0, %c0_0, %c0_1, %c0_2] : memref<1x1x4x18xf32, #tpu.memory_space<vmem>>, vector<1x1x4x18xf32>
    %1 = vector.shape_cast %0 : vector<1x1x4x18xf32> to vector<4x18xf32>
    %2 = vector.extract_strided_slice %1 {offsets = [0, 0], sizes = [4, 16], strides = [1, 1]} : vector<4x18xf32> to vector<4x16xf32>
    %3 = vector.extract_strided_slice %1 {offsets = [0, 1], sizes = [4, 16], strides = [1, 1]} : vector<4x18xf32> to vector<4x16xf32>
    %4 = vector.extract_strided_slice %1 {offsets = [0, 2], sizes = [4, 16], strides = [1, 1]} : vector<4x18xf32> to vector<4x16xf32>
    %5 = tpu.concatenate %2, %3, %4 in 0 : vector<4x16xf32>, vector<4x16xf32>, vector<4x16xf32> -> vector<12x16xf32>
    %c0_3 = arith.constant 0 : index
    %c0_4 = arith.constant 0 : index
    %6 = vector.load %arg3[%c0_3, %c0_4] : memref<8x12xf32, #tpu.memory_space<vmem>>, vector<8x12xf32>
    %cst = arith.constant dense<0.000000e+00> : vector<8x16xf32>
    %7 = tpu.matmul %6, %5, %cst {dimension_numbers = #tpu.dot_dimension_numbers<[1], [0], [0], [1], [0, 0, 1, 1], [], []>} : vector<8x12xf32>, vector<12x16xf32>, vector<8x16xf32> -> vector<8x16xf32>
    %c0_5 = arith.constant 0 : index
    %c0_6 = arith.constant 0 : index
    %8 = vector.load %arg4[%c0_5, %c0_6] : memref<8x1xf32, #tpu.memory_space<vmem>>, vector<8x1xf32>
    %9 = vector.broadcast %8 : vector<8x1xf32> to vector<8x16xf32>
    %10 = arith.addf %7, %9 : vector<8x16xf32>
    %c0_7 = arith.constant 0 : index
    %c0_8 = arith.constant 0 : index
    %c0_9 = arith.constant 0 : index
    %11 = vector.load %arg5[%c0_7, %c0_8, %c0_9] : memref<1x8x16xf32, #tpu.memory_space<vmem>>, vector<1x8x16xf32>
    %12 = vector.shape_cast %11 : vector<1x8x16xf32> to vector<8x16xf32>
    %13 = vector.shape_cast %10 : vector<8x16xf32> to vector<1x8x16xf32>
    tpu.vector_store %arg5[%c0_7, %c0_8, %c0_9], %13 {strides = array<i32>} : memref<1x8x16xf32, #tpu.memory_space<vmem>>, vector<1x8x16xf32>,
    %cst_10 = arith.constant dense<0.000000e+00> : vector<8xf32>
    %14 = vector.multi_reduction <add>, %10, %cst_10 [1] : vector<8x16xf32> to vector<8xf32>
    %15 = vector.shape_cast %14 : vector<8xf32> to vector<8x1xf32>
    %16 = arith.mulf %10, %10 : vector<8x16xf32>
    %cst_11 = arith.constant dense<0.000000e+00> : vector<8xf32>
    %17 = vector.multi_reduction <add>, %16, %cst_11 [1] : vector<8x16xf32> to vector<8xf32>
    %18 = vector.shape_cast %17 : vector<8xf32> to vector<8x1xf32>
    %19 = tpu.concatenate %15, %18 in 1 : vector<8x1xf32>, vector<8x1xf32> -> vector<8x2xf32>
    %c0_12 = arith.constant 0 : index
    %c0_13 = arith.constant 0 : index
    %c0_14 = arith.constant 0 : index
    %c0_15 = arith.constant 0 : index
    %20 = vector.load %arg6[%c0_12, %c0_13, %c0_14, %c0_15] : memref<1x1x8x2xf32, #tpu.memory_space<vmem>>, vector<1x1x8x2xf32>
    %21 = vector.shape_cast %20 : vector<1x1x8x2xf32> to vector<8x2xf32>
    %22 = vector.shape_cast %19 : vector<8x2xf32> to vector<1x1x8x2xf32>
    tpu.vector_store %arg6[%c0_12, %c0_13, %c0_14, %c0_15], %22 {strides = array<i32>} : memref<1x1x8x2xf32, #tpu.memory_space<vmem>>, vector<1x1x8x2xf32>,
    return
  }
  func.func @transform_0(%arg0: i32, %arg1: i32) -> (i32, i32, i32, i32) {
    %c0_i32 = arith.constant 0 : i32
    %c0_i32_0 = arith.constant 0 : i32
    %c0_i32_1 = arith.constant 0 : i32
    return %arg0, %arg1, %c0_i32, %c0_i32_0 : i32, i32, i32, i32
  }
  func.func @transform_1(%arg0: i32, %arg1: i32) -> (i32, i32) {
    %c0_i32 = arith.constant 0 : i32
    %c0_i32_0 = arith.constant 0 : i32
    %c0_i32_1 = arith.constant 0 : i32
    return %c0_i32, %c0_i32_0 : i32, i32
  }
  func.func @transform_2(%arg0: i32, %arg1: i32) -> (i32, i32) {
    %c0_i32 = arith.constant 0 : i32
    %c0_i32_0 = arith.constant 0 : i32
    %c0_i32_1 = arith.constant 0 : i32
    return %c0_i32, %c0_i32_0 : i32, i32
  }
  func.func @transform_3(%arg0: i32, %arg1: i32) -> (i32, i32, i32) {
    %c0_i32 = arith.constant 0 : i32
    %c0_i32_0 = arith.constant 0 : i32
    return %arg0, %c0_i32, %arg1 : i32, i32, i32
  }
  func.func @transform_4(%arg0: i32, %arg1: i32) -> (i32, i32, i32, i32) {
    %c0_i32 = arith.constant 0 : i32
    %c0_i32_0 = arith.constant 0 : i32
    %c0_i32_1 = arith.constant 0 : i32
    return %arg0, %arg1, %c0_i32, %c0_i32_0 : i32, i32, i32, i32
  }
}

</mosaic_0001>

<bundles_post_ra>
// kernel: conv_block.2
= control target key start
LH: loop header
LB: loop body
LE: loop exit
PB: predicated region body
PF: predicated region fallthrough
CT: control target
= control target key end

     0   :  { %s579_s15 = smov 0   ;;  %s581_s16 = smov 0   ;;  %s625_s0 = inlined_call_operand.vmem [shape: f32[2,1,4,18], index: 0, kind: input, shape index: {}]   ;;  %s626_s1 = inlined_call_operand.vmem [shape: f32[8,12], index: 1, kind: input, shape index: {}]   ;;  %s627_s2 = inlined_call_operand.vmem [shape: f32[8,1], index: 2, kind: input, shape index: {}]   ;;  %s628_s3 = inlined_call_operand.vmem [shape: f32[2,8,16], index: 3, kind: output, shape index: {0}]   ;;  %s629_s4 = inlined_call_operand.vmem [shape: f32[2,1,8,2], index: 4, kind: output, shape index: {1}]  }
   0x1   :  { %s583_s17 = smov 0  }
   0x2 LB: > { %s27_s18 = sadd.s32 1, %s541_s16  ;;  %p468_p0 = scmp.ge.s32.totalorder %s545_s17, 1  ;;  %s545_s17 = sphi %s583_s17, %s15_s17   ;;  %s541_s16 = sphi %s581_s16, %s631_s16   ;;  %s537_s15 = sphi %s579_s15, %s630_s15  }
   0x3   : > { %p29_p1 = scmp.ge.s32.totalorder %s27_s18, 2  ;;  %p185_p2 = scmp.lt.s32.totalorder %s545_s17, 3 }
   0x5   : > { %s633_s18 = smov (%p29_p1, %s27_s18), 0  ;;  %p186_p3 = pnand %p468_p0, %p185_p2 }
   0x6   : > { %p222_p4 = scmp.lt.s32.totalorder (!%p186_p3), %s537_s15, 1  ;;  %v547_v0 = vmov (!%p186_p3), 0.0|0.0   ;;  %vm548_vm0 = vmmov (!%p186_p3), 0   ;;  %v549_v1 = vmov (!%p186_p3), 0.0   ;;  %v254_v2 = vld [vmem:[%s627_s2] sm:$0xff] (!%p186_p3)  ;;  %v550_v4 = vmov (!%p186_p3), 0  }
   0x7   : > { %189 = sbr.rel (%p186_p3) target bundleno = 505 (0x1f9), region = 32  ;;  %486 = vmatprep.subr.bf16.mxu0 (!%p186_p3), %v547_v0  ;;  %483 = vmatprep.mubr.msk.f32.mxu0 (!%p186_p3), %vm548_vm0, %v549_v1  ;;  %s551_s25 = smov (!%p186_p3), 127   ;;  %vm251_vm1 = vcmask (!%p186_p3), 1043456   ;;  %vm553_vm2 = vmmov (!%p186_p3), 1   ;;  %v253_v10 = vld [vmem:[%s626_s1] sm:$0xff] (!%p186_p3)  ;;  %vm260_vm4 = vcmask (!%p186_p3), 97280  }
   0x8   : > { %521 = vset.pattern.permute.xlu1 (!%p186_p3), %v550_v4  ;;  %522 = vset.pattern.permute.xlu0 (!%p186_p3), %v550_v4  ;;  %s552_s26 = smov (!%p186_p3), 126   ;;  %vm488_vm3 = vmpackc.low (!%p186_p3), %vm251_vm1, %vm553_vm2  ;;  %vm336_vm5 = vcmask (!%p186_p3), 130048   ;;  %vm345_vm6 = vcmask (!%p186_p3), 7168   ;;  %vm347_vm7 = vcmask (!%p186_p3), 15360  }
   0x9   : > { %257 = vperm.xlu1 (!%p186_p3), %521, %v254_v2  }
   0xe   : > { %s635_s15 = smov (!%p222_p4, %s537_s15), 1 }
   0xf   : > { %s469_s19 = sshll.u32 %s635_s15, 2  ;;  %s470_s29 = sshll.u32 %s635_s15, 3 }
  0x10   : > { %s228_s22 = scalar_lea.vmem %s625_s0, %s469_s19  ;;  %s235_s6 = scalar_lea.vmem %s628_s3, %s470_s29 }
  0x11   : > { %v243_v3 = vld [vmem:[%s228_s22] sm:$0xf]  ;;  %s242_s9 = scalar_lea.vmem %s629_s4, %s470_s29 }
  0x12   : > { %v245_v5 = vrot.slane %v243_v3, 4 }
  0x14   : > { %246 = vrot.lane.b32.xlu0 %v245_v5, %s551_s25 }
  0x18   : > { %249 = vrot.lane.b32.xlu0 %v243_v3, %s552_s26 }
  0x86   : > { %v247_v6 = vpop.permute.xlu0 %246 }
  0x87   : > { %v252_v7 = vsel %vm251_vm1, %v243_v3, %v247_v6 }
  0x88   : > { %v258_v11 = vpop.permute.xlu1 %257 }
  0x8a   : > { %v250_v8 = vpop.permute.xlu0 %249 }
  0x8b   : > { %v487_v9 = vpack.c.bf16 %v250_v8, %v252_v7 }
  0x8d   : > { %489 = vmatpush3.bf16.msk.msra.mxu0 %vm488_vm3, %v487_v9 }
  0x90   : > { %484 = vmatmul.mubr.msk.f32.vlgmr.msra.gmra.mrb[0].mxu0 %vm260_vm4, %v253_v10 }
 0x163   : > { %v332_v12 = vpop.f32.mrb[0].mxu0 }
 0x164   : > { %v333_v13 = vadd.f32 %v332_v12, %v258_v11  ;;  %v485_v14 = vpop.f32.mrb[1].mxu0 }
 0x166   : > { %v338_v15 = vsel %vm336_vm5, %v333_v13, 0.0  ;;  %337 = vst.msk [vmem:[%s235_s6] sm:$0xff] %vm336_vm5, %v333_v13  ;;  %v341_v16 = vmul.f32 %v333_v13, %v333_v13 }
 0x167   : > { %339 = vadd.xlane.f32.xlu1 %v338_v15 }
 0x168   : > { %v342_v17 = vsel %vm336_vm5, %v341_v16, 0.0 }
 0x169   : > { %343 = vadd.xlane.f32.xlu0 %v342_v17 }
 0x1f4   : > { %v340_v18 = vpop.xlane.xlu1 %339 }
 0x1f6   : > { %v344_v19 = vpop.xlane.xlu0 %343 }
 0x1f7   : > { %v346_v20 = vsel %vm345_vm6, %v340_v18, %v344_v19 }
 0x1f8   : > { %348 = vst.msk [vmem:[%s242_s9] sm:$0xff] %vm347_vm7, %v346_v20 }
 0x1f9 PF: > { %s15_s17 = sadd.s32 1, %s545_s17   ;;  %s630_s15 = smov %s541_s16 }
 0x1fa   : > { %p12_p5 = scmp.ge.s32.totalorder %s15_s17, 4   ;;  %s631_s16 = smov %s633_s18 }
 0x1fc   :  { %14 = sbr.rel (!%p12_p5) target bundleno = 2 (0x2), region = 74 }

// kernel: conv_block.3
= control target key start
LH: loop header
LB: loop body
LE: loop exit
PB: predicated region body
PF: predicated region fallthrough
CT: control target
= control target key end

     0   :  { %s623_s0 = inlined_call_operand.vmem [shape: f32[2,8,16], index: 0, kind: input, shape index: {}]   ;;  %s624_s1 = inlined_call_operand.vmem [shape: f32[8,1], index: 1, kind: input, shape index: {}]   ;;  %s625_s2 = inlined_call_operand.vmem [shape: f32[8,1], index: 2, kind: input, shape index: {}]   ;;  %s626_s3 = inlined_call_operand.<no memory space> [shape: f32[1], index: 3, kind: input, shape index: {}]   ;;  %s627_s4 = inlined_call_operand.hbm [shape: f32[2,8,16], index: 4, kind: output, shape index: {}]  }
   0x1   :  { %9 = sst [smem:[#allocation2]] %s626_s3 }
   0x2   :  { %10 = vsyncpa [#allocation4], 0 }
   0x3   :  { %12 = vsyncpa [#allocation4 + $0x1], 0  ;;  %s505_s17 = smov 0   ;;  %s507_s18 = smov 0  }
   0x4   :  { %s509_s19 = smov 0   ;;  %s511_s20 = smov 0  }
   0x5   :  { %s513_s21 = smov 0   ;;  %s515_s22 = smov 0  }
   0x6 LB: > { %s327_s3 = sadd.s32 4294967295, %s473_s22   ;;  %s328_s23 = sadd.s32 4294967294, %s473_s22   ;;  %s473_s22 = sphi %s515_s22, %s18_s22   ;;  %s469_s21 = sphi %s513_s21, %s634_s21   ;;  %s465_s20 = sphi %s511_s20, %s633_s20   ;;  %s461_s19 = sphi %s509_s19, %s632_s19   ;;  %s457_s18 = sphi %s507_s18, %s631_s18   ;;  %s453_s17 = sphi %s505_s17, %s630_s17  }
   0x7   : > { %s30_s24 = sadd.s32 1, %s469_s21  ;;  %s130_s25 = sadd.s32 1, %s461_s19 }
   0x8   : > { %p32_p0 = scmp.ge.s32.totalorder %s30_s24, 2  ;;  %p140_p1 = scmp.ne.s32.totalorder %s461_s19, %s457_s18 }
   0x9   : > { %p141_p2 = scmp.eq.s32.totalorder %s327_s3, 1  ;;  %p146_p3 = scmp.ne.s32.totalorder %s457_s18, %s453_s17 }
   0xa   : > { %s636_s24 = smov (%p32_p0, %s30_s24), 0  ;;  %p147_p5 = scmp.eq.s32.totalorder %s328_s23, 1 }
   0xb   : > { %p545_p4 = por %p141_p2, %p140_p1  ;;  %s125_s27 = ssub.s32 %s469_s21, %s636_s24 }
   0xc   : > { %p331_p6 = scmp.ge.s32.totalorder %s473_s22, 1  ;;  %p128_p7 = scmp.eq.s32.totalorder %s125_s27, 0 }
   0xd   : > { %p552_p8 = por %p147_p5, %p146_p3  ;;  %p184_p9 = scmp.lt.s32.totalorder %s473_s22, 3 }
   0xe   : > { %s558_s29 = scalar_select %p128_p7, %s461_s19, %s130_s25  }
   0xf   : > { %p185_p10 = pnand %p331_p6, %p184_p9 }
  0x10   : > { %v220_v0 = vld [vmem:[%s624_s1] sm:$0xff] (!%p185_p10)  ;;  %v475_v1 = vmov (!%p185_p10), 0   ;;  %p212_p11 = scmp.lt.s32.totalorder (!%p185_p10), %s465_s20, 1  ;;  %s234_s10 = sld [smem:[#allocation2]] (!%p185_p10)  ;;  %vm239_vm1 = vcmask (!%p185_p10), 130048  }
  0x11   : > { %188 = sbr.rel (%p185_p10) target bundleno = 169 (0xa9), region = 36  ;;  %394 = vset.pattern.permute.xlu0 (!%p185_p10), %v475_v1  ;;  %v227_v2 = vld [vmem:[%s625_s2] sm:$0xff] (!%p185_p10)  ;;  %s209_s11 = sand.u32 (!%p185_p10), 1, %s457_s18  }
  0x12   : > { %223 = vperm.xlu0 (!%p185_p10), %394, %v220_v0   ;;  %s332_s15 = sshll.u32 (!%p185_p10), %s209_s11, 3  ;;  %s335_s16 = sshll.u32 (!%p185_p10), %s465_s20, 7 }
  0x13   : > { %s211_s3 = scalar_lea.vmem (!%p185_p10), [#allocation3], %s332_s15  ;;  %s576_s30 = scalar_lea.hbm (!%p185_p10), %s627_s4, %s335_s16 }
  0x14   : > { %s256_s23 = sshll.u32 (!%p185_p10), %s211_s3, 4  ;;  %s242_s5 = scalar_lea.sflag (!%p185_p10), [#allocation4], %s209_s11  ;;  %s578_s23 = int_to_ptr.vmem [resolvable:$true] %s256_s23 }
  0x15   : > { %s395_s6 = scalar_lea.vmem (!%p185_p10), %s578_s23, 128 }
  0x16   : > { %230 = vperm.xlu0 (!%p185_p10), %394, %v227_v2   ;;  %v236_v6 = vstv (!%p185_p10), %s234_s10  ;;  %p396_p12 = scmp.ne.s32.totalorder (!%p185_p10), %s578_s23, %s395_s6 }
  0x18   : > { %s213_s8 = scalar_select %p212_p11, %s465_s20, 1 }
  0x19   : > { %p397_p13 = pnand %p396_p12, %p545_p4  ;;  %s476_s20 = smov [#allocation3]  }
  0x1a   : > { %s333_s9 = sshll.u32 %s213_s8, 3  ;;  %s399_s7 = sshll.u32 %s476_s20, 4  ;;  %s400_s7 = int_to_ptr.vmem [resolvable:$false] %s399_s7 }
  0x1b   : > { %s218_s14 = scalar_lea.vmem %s623_s0, %s333_s9  ;;  %p398_p0 = pneg %p397_p13 }
  0x1c   : > { %v219_v4 = vld [vmem:[%s218_s14] sm:$0xff]  ;;  %s401_s8 = scalar_lea.vmem %s400_s7, 256  ;;  %p402_p1 = scmp.lt.s32.totalorder %s578_s23, %s400_s7 }
  0x1d   : > { %p403_p2 = scmp.lt.s32.totalorder %s401_s8, %s395_s6 }
  0x1f   : > { %p404_p3 = por %p403_p2, %p402_p1 }
  0x21   : > { %p405_p5 = pnand %p404_p3, %p398_p0 }
  0x91   : > { %v224_v3 = vpop.permute.xlu0 %223 }
  0x92   : > { %v226_v5 = vmul.f32 %v224_v3, %v219_v4 }
  0x95   : > { %v231_v7 = vpop.permute.xlu0 %230 }
  0x96   : > { %v233_v8 = vadd.f32 %v231_v7, %v226_v5 }
  0x98   : > { %vm235_vm0 = vcmp.gt.f32.partialorder %v233_v8, 0.0  ;;  %v237_v9 = vmul.f32 %v236_v6, %v233_v8 }
  0x9a   : > { %v238_v10 = vsel %vm235_vm0, %v233_v8, %v237_v9 }
  0x9b   : > { %240 = vst.msk [vmem:[%s211_s3] sm:$0xff] %vm239_vm1, %v238_v10 }
  0x9c   : > { %408 = shalt.err (!%p405_p5)
}
  0x9d   : > { %s409_s9 = scalar_lea.hbm %s576_s30, 128  ;;  %s413_s12 = scalar_lea.hbm %s627_s4, 256 }
  0x9e   : > { %p410_p6 = scmp.ne.s32.totalorder %s576_s30, %s409_s9  ;;  %p414_p10 = scmp.lt.u32.totalorder %s576_s30, %s627_s4 }
  0x9f   : > { %p415_p11 = scmp.lt.u32.totalorder %s413_s12, %s409_s9  ;;  %p417_p13 = scmp.lt.u32.totalorder %s409_s9, %s576_s30 }
  0xa0   : > { %p411_p7 = pnand %p410_p6, %p545_p4 }
  0xa1   : > { %p416_p12 = por %p415_p11, %p414_p10 }
  0xa2   : > { %p412_p9 = pneg %p411_p7 }
  0xa3   : > { %p418_p0 = por %p417_p13, %p416_p12 }
  0xa5   : > { %p419_p1 = pnand %p418_p0, %p412_p9 }
  0xa7   : > { %422 = shalt.err (!%p419_p1)
}
  0xa8   : > { %338 = dma.vmem_to_hbm [thread:$0]  (%p545_p4), %s578_s23, 128, %s576_s30, %s242_s5  }
  0xa9 PF: > { %p344_p2 = scmp.ge.s32.totalorder %s473_s22, 2  ;;  %s268_s15 = sand.u32 1, %s453_s17  }
  0xaa   : > { %s269_s16 = scalar_lea.sflag [#allocation4], %s268_s15 }
  0xab   : > { %p341_p3 = pnand %p344_p2, %p552_p8 }
  0xad   : > { %448 = dma.done.wait (!%p341_p3), %s269_s16, 128  }
  0xae   : > { %450 = vsyncadd (!%p341_p3), %s269_s16, 4294967168  ;;  %s18_s22 = sadd.s32 1, %s473_s22   ;;  %s630_s17 = smov %s457_s18 }
  0xaf   : > { %p15_p5 = scmp.ge.s32.totalorder %s18_s22, 4   ;;  %s631_s18 = smov %s461_s19 }
  0xb0   : > { %s632_s19 = smov %s558_s29  ;;  %s633_s20 = smov %s469_s21 }
  0xb1   : > { %s634_s21 = smov %s636_s24  ;;  %17 = sbr.rel (!%p15_p5) target bundleno = 6 (0x6), region = 71 }
  0xb8   :  { %274 = vsyncpa [#allocation4], 1 }
  0xb9   :  { %276 = vsyncpa [#allocation4 + $0x1], 1 }

</bundles_post_ra>
